<compile_context>
chip_gen: v7x
topology: tpu7x:2x2x1
jax: 0.10.0
libtpu: 0.0.40
codegen_flags: <defaults>
</compile_context>

<pallas_src>
import functools

import jax
import jax.numpy as jnp
from jax import lax
from jax.experimental import pallas as pl
from jax.experimental.pallas import tpu as pltpu

P = 8  # batch elements packed per lane column (fills the 8 f32 sublanes of a tile)


def valuenet_kernel(xT_ref, w1_ref, b1_ref, w2_ref, b2_ref, o_ref):
    # fc1 on the MXU: block-diagonal (P*hidden, P*S) @ (P*S, tile_cols) -> (P*hidden, tile_cols)
    # with f32 accumulation; each packed batch element's dot product stays independent.
    h = jnp.dot(w1_ref[...], xT_ref[...], preferred_element_type=jnp.float32)
    # Bias + ReLU: the only remaining VPU work (fc2 moved onto the MXU).
    h = jnp.maximum(h + b1_ref[...], 0.0)
    # fc2 on the MXU too (block-diagonal row-of-w2): frees the VPU/XLU of the scale +
    # sublane reduction and directly produces the sublane/lane-dense (P, tile_cols) slab.
    out = jnp.dot(w2_ref[...], h, preferred_element_type=jnp.float32) + b2_ref[0, 0]
    o_ref[...] = out.astype(o_ref.dtype)


def _round_up(n: int, m: int) -> int:
    return ((n + m - 1) // m) * m


def _cdiv(a: int, b: int) -> int:
    return -(-a // b)


@functools.partial(jax.jit, static_argnames=("tile_b", "use_bf16"))
def value_net_forward(x, w1, b1, w2, b2, *, tile_b=32768, use_bf16=False):
    """x: [B, state_dim]; w1: [hidden, state_dim]; b1: [hidden]; w2: [1, hidden]; b2: [1]
    (PyTorch nn.Linear layouts).  Returns [B, 1] f32 = fc2(relu(fc1(x)))."""
    B, S = x.shape
    hidden = w1.shape[0]

    # ---- tiling: lane columns; each column carries P packed batch elements ----
    cols_needed = _round_up(_cdiv(B, P), 128)                       # multiple of 128 lanes
    tile_cols = min(_round_up(max(tile_b // P, 128), 128), cols_needed)
    num_tiles = _cdiv(cols_needed, tile_cols)
    # v7x megacore: give big batches >= 2 parallel tiles so both TensorCores get work
    # (one extra ~0.35 us grid step on v5e/v6e -- harmless).
    if num_tiles == 1 and cols_needed >= 256:
        tile_cols = _round_up(_cdiv(cols_needed, 2), 128)
        num_tiles = _cdiv(cols_needed, tile_cols)
    cols_total = num_tiles * tile_cols
    B_pad = P * cols_total

    in_dtype = jnp.bfloat16 if use_bf16 else jnp.float32

    # ---- pack x: [B, S] -> [P*S, cols_total]; batch element b = j*P + p sits in column j ----
    x_pad = jnp.pad(x, ((0, B_pad - B), (0, 0)))
    xT = (x_pad.reshape(cols_total, P, S)
               .transpose(1, 2, 0)
               .reshape(P * S, cols_total)
               .astype(in_dtype))

    # ---- block-diagonal weights (tiny: <= a few tens of KiB) ----
    eye_p = jnp.eye(P, dtype=jnp.float32)
    w1_big = jnp.kron(eye_p, w1.astype(jnp.float32)).astype(in_dtype)        # [P*hidden, P*S]
    b1_big = jnp.tile(b1.astype(jnp.float32).reshape(hidden, 1), (P, 1))     # [P*hidden, 1]
    w2_big = jnp.kron(eye_p, w2.astype(jnp.float32).reshape(1, hidden))      # [P, P*hidden]
    b2_in = b2.reshape(1, 1).astype(jnp.float32)                             # SMEM scalar

    out_packed = pl.pallas_call(
        valuenet_kernel,
        out_shape=jax.ShapeDtypeStruct((P, cols_total), jnp.float32),
        grid_spec=pltpu.PrefetchScalarGridSpec(
            num_scalar_prefetch=0,
            grid=(num_tiles,),
            in_specs=[
                # Packed x streamed tile-by-tile along the lane axis (pipelined DMA).
                pl.BlockSpec((P * S, tile_cols), lambda i: (0, i)),
                # Weights/bias: constant index_map -> VMEM-resident, DMA'd once.
                pl.BlockSpec((P * hidden, P * S), lambda i: (0, 0)),
                pl.BlockSpec((P * hidden, 1), lambda i: (0, 0)),
                pl.BlockSpec((P, P * hidden), lambda i: (0, 0)),
                # Scalar output bias on the scalar path.
                pl.BlockSpec(memory_space=pltpu.SMEM),
            ],
            out_specs=pl.BlockSpec((P, tile_cols), lambda i: (0, i)),
        ),
        compiler_params=pltpu.CompilerParams(
            # Independent batch tiles: megacore sharding on v7x, harmless on v5e/v6e.
            dimension_semantics=("parallel",),
            # ~6-8 MiB actually used at the default tile; 32 MiB is safe on every
            # generation (v7x physical VMEM = 64 MiB) with ample headroom.
            vmem_limit_bytes=32 * 1024 * 1024,
            # Let XLA fuse the pad/pack relayout of x into the Pallas input read so x
            # is not materialized twice in HBM (operand 0 only).
            allow_input_fusion=[True, False, False, False, False],
        ),
    )(xT, w1_big, b1_big, w2_big, b2_in)

    # Unpack: element b = j*P + p  ->  transpose + flatten, drop batch padding.
    return out_packed.T.reshape(B_pad, 1)[:B]


def init_params(key, state_dim, hidden_dim):
    """PyTorch nn.Linear default init (U(-1/sqrt(fan_in), 1/sqrt(fan_in))), torch layouts."""
    k1, k2, k3, k4 = jax.random.split(key, 4)
    bound1 = 1.0 / float(state_dim) ** 0.5
    bound2 = 1.0 / float(hidden_dim) ** 0.5
    w1 = jax.random.uniform(k1, (hidden_dim, state_dim), jnp.float32, -bound1, bound1)
    b1 = jax.random.uniform(k2, (hidden_dim,), jnp.float32, -bound1, bound1)
    w2 = jax.random.uniform(k3, (1, hidden_dim), jnp.float32, -bound2, bound2)
    b2 = jax.random.uniform(k4, (1,), jnp.float32, -bound2, bound2)
    return w1, b1, w2, b2


if __name__ == "__main__":
    batch, state_dim, hidden_dim = 8, 4, 32
    key = jax.random.PRNGKey(0)
    kx, kp, kb = jax.random.split(key, 3)

    # Snap test inputs to bf16-representable f32 values: products of such values are
    # exact in f32, so the reference matches the kernel tightly regardless of how many
    # MXU passes Mosaic uses for f32 contractions on a given TPU generation.  The
    # tolerance below additionally covers the f32 h operand of the fc2 matmul.
    snap = lambda a: a.astype(jnp.bfloat16).astype(jnp.float32)

    x = snap(jax.random.normal(kx, (batch, state_dim), dtype=jnp.float32))
    w1, b1, w2, b2 = [snap(p) for p in init_params(kp, state_dim, hidden_dim)]

    def ref(xx):  # exact PyTorch forward semantics: fc2(relu(fc1(x)))
        h = jnp.maximum(
            jnp.dot(xx, w1.T, precision=lax.Precision.HIGHEST) + b1[None, :], 0.0)
        return jnp.dot(h, w2.T, precision=lax.Precision.HIGHEST) + b2[None, :]

    # Small batch: single-tile path.
    out = jax.block_until_ready(value_net_forward(x, w1, b1, w2, b2))
    assert out.shape == (batch, 1)
    assert jnp.allclose(out, ref(x), atol=2e-2, rtol=2e-2)

    # Larger, non-multiple batch with the default tile: exercises padding and the
    # ">=2 tiles for megacore" split.
    x_big = snap(jax.random.normal(kb, (5000, state_dim), dtype=jnp.float32))
    out_big = jax.block_until_ready(value_net_forward(x_big, w1, b1, w2, b2))
    assert out_big.shape == (5000, 1)
    assert jnp.allclose(out_big, ref(x_big), atol=2e-2, rtol=2e-2)

    # Small explicit tile: exercises the multi-tile (grid=5) pipelined path.
    out_tiled = jax.block_until_ready(
        value_net_forward(x_big, w1, b1, w2, b2, tile_b=1024))
    assert jnp.allclose(out_tiled, ref(x_big), atol=2e-2, rtol=2e-2)

    # bf16 x/W1 path (only worthwhile with the packed layout, where it halves the x stream).
    out_bf16 = jax.block_until_ready(value_net_forward(x, w1, b1, w2, b2, use_bf16=True))
    assert jnp.allclose(out_bf16, ref(x), atol=2e-2, rtol=2e-2)

    print("KERNEL_OK")
</pallas_src>

<mosaic_0001>
module attributes {stable_mosaic.version = 11 : i64} {
  func.func @valuenet_kernel(%arg0: i32, %arg1: memref<32x128xf32, #tpu.memory_space<vmem>>, %arg2: memref<256x32xf32, #tpu.memory_space<vmem>>, %arg3: memref<256x1xf32, #tpu.memory_space<vmem>>, %arg4: memref<8x256xf32, #tpu.memory_space<vmem>>, %arg5: memref<1x1xf32, #tpu.memory_space<smem>>, %arg6: memref<8x128xf32, #tpu.memory_space<vmem>>) attributes {dimension_semantics = [#tpu.dimension_semantics<parallel>], iteration_bounds = array<i64: 1>, scalar_prefetch = 0 : i64, scratch_operands = 0 : i64, tpu.core_type = #tpu.core_type<tc>, window_params = [{transform_indices = @transform_0, window_bounds = array<i64: 32, 128>}, {pipeline_mode = #tpu.pipeline_mode<synchronous>, transform_indices = @transform_1, window_bounds = array<i64: 256, 32>}, {pipeline_mode = #tpu.pipeline_mode<synchronous>, transform_indices = @transform_2, window_bounds = array<i64: 256, 1>}, {pipeline_mode = #tpu.pipeline_mode<synchronous>, transform_indices = @transform_3, window_bounds = array<i64: 8, 256>}, {transform_indices = @transform_4, window_bounds = array<i64: 1, 1>}, {transform_indices = @transform_5, window_bounds = array<i64: 8, 128>}]} {
    %c0 = arith.constant 0 : index
    %c0_0 = arith.constant 0 : index
    %0 = vector.load %arg2[%c0, %c0_0] : memref<256x32xf32, #tpu.memory_space<vmem>>, vector<256x32xf32>
    %c0_1 = arith.constant 0 : index
    %c0_2 = arith.constant 0 : index
    %1 = vector.load %arg1[%c0_1, %c0_2] : memref<32x128xf32, #tpu.memory_space<vmem>>, vector<32x128xf32>
    %cst = arith.constant dense<0.000000e+00> : vector<256x128xf32>
    %2 = tpu.matmul %0, %1, %cst {dimension_numbers = #tpu.dot_dimension_numbers<[1], [0], [0], [1], [0, 0, 1, 1], [], []>} : vector<256x32xf32>, vector<32x128xf32>, vector<256x128xf32> -> vector<256x128xf32>
    %c0_3 = arith.constant 0 : index
    %c0_4 = arith.constant 0 : index
    %3 = vector.load %arg3[%c0_3, %c0_4] : memref<256x1xf32, #tpu.memory_space<vmem>>, vector<256x1xf32>
    %4 = vector.broadcast %3 : vector<256x1xf32> to vector<256x128xf32>
    %5 = arith.addf %2, %4 : vector<256x128xf32>
    %cst_5 = arith.constant 0.000000e+00 : f32
    %6 = vector.broadcast %cst_5 : f32 to vector<256x128xf32>
    %7 = arith.maximumf %5, %6 : vector<256x128xf32>
    %c0_6 = arith.constant 0 : index
    %c0_7 = arith.constant 0 : index
    %8 = vector.load %arg4[%c0_6, %c0_7] : memref<8x256xf32, #tpu.memory_space<vmem>>, vector<8x256xf32>
    %cst_8 = arith.constant dense<0.000000e+00> : vector<8x128xf32>
    %9 = tpu.matmul %8, %7, %cst_8 {dimension_numbers = #tpu.dot_dimension_numbers<[1], [0], [0], [1], [0, 0, 1, 1], [], []>} : vector<8x256xf32>, vector<256x128xf32>, vector<8x128xf32> -> vector<8x128xf32>
    %c0_9 = arith.constant 0 : index
    %c0_10 = arith.constant 0 : index
    %10 = memref.load %arg5[%c0_9, %c0_10] : memref<1x1xf32, #tpu.memory_space<smem>>
    %11 = vector.broadcast %10 : f32 to vector<8x128xf32>
    %12 = arith.addf %9, %11 : vector<8x128xf32>
    %c0_11 = arith.constant 0 : index
    %c0_12 = arith.constant 0 : index
    %13 = vector.load %arg6[%c0_11, %c0_12] : memref<8x128xf32, #tpu.memory_space<vmem>>, vector<8x128xf32>
    tpu.vector_store %arg6[%c0_11, %c0_12], %12 {strides = array<i32>} : memref<8x128xf32, #tpu.memory_space<vmem>>, vector<8x128xf32>,
    return
  }
  func.func @transform_0(%arg0: i32) -> (i32, i32) {
    %c0_i32 = arith.constant 0 : i32
    %c0_i32_0 = arith.constant 0 : i32
    return %c0_i32, %arg0 : i32, i32
  }
  func.func @transform_1(%arg0: i32) -> (i32, i32) {
    %c0_i32 = arith.constant 0 : i32
    %c0_i32_0 = arith.constant 0 : i32
    %c0_i32_1 = arith.constant 0 : i32
    return %c0_i32, %c0_i32_0 : i32, i32
  }
  func.func @transform_2(%arg0: i32) -> (i32, i32) {
    %c0_i32 = arith.constant 0 : i32
    %c0_i32_0 = arith.constant 0 : i32
    %c0_i32_1 = arith.constant 0 : i32
    return %c0_i32, %c0_i32_0 : i32, i32
  }
  func.func @transform_3(%arg0: i32) -> (i32, i32) {
    %c0_i32 = arith.constant 0 : i32
    %c0_i32_0 = arith.constant 0 : i32
    %c0_i32_1 = arith.constant 0 : i32
    return %c0_i32, %c0_i32_0 : i32, i32
  }
  func.func @transform_4(%arg0: i32) -> (i32, i32) {
    %c0_i32 = arith.constant 0 : i32
    %c0_i32_0 = arith.constant 0 : i32
    %c0_i32_1 = arith.constant 0 : i32
    return %c0_i32, %c0_i32_0 : i32, i32
  }
  func.func @transform_5(%arg0: i32) -> (i32, i32) {
    %c0_i32 = arith.constant 0 : i32
    %c0_i32_0 = arith.constant 0 : i32
    return %c0_i32, %arg0 : i32, i32
  }
}

</mosaic_0001>

<bundles_post_ra>
// kernel: value_net_forward.1
= control target key start
LH: loop header
LB: loop body
LE: loop exit
PB: predicated region body
PF: predicated region fallthrough
CT: control target
= control target key end

     0   :  { %vm249_vm0 = vcmask 261120   ;;  %v884_v3 = vmov 0   ;;  %s1235_s0 = inlined_call_operand.vmem [shape: f32[32,128], index: 0, kind: input, shape index: {}]   ;;  %s1236_s1 = inlined_call_operand.vmem [shape: f32[256,32], index: 1, kind: input, shape index: {}]   ;;  %s1237_s2 = inlined_call_operand.vmem [shape: f32[256,1], index: 2, kind: input, shape index: {}]   ;;  %s1238_s3 = inlined_call_operand.vmem [shape: f32[8,256], index: 3, kind: input, shape index: {}]   ;;  %s1239_s4 = inlined_call_operand.<no memory space> [shape: f32[1,1], index: 4, kind: input, shape index: {}]   ;;  %s1240_s5 = inlined_call_operand.vmem [shape: f32[8,128], index: 5, kind: output, shape index: {}]  }
   0x1   :  { %v53_v0 = vld [vmem:[%s1235_s0] sm:$0xff]  ;;  %v54_v1 = vld [vmem:[%s1235_s0 + $0x8] sm:$0xff]  ;;  %v55_v2 = vld [vmem:[%s1235_s0 + $0x10] sm:$0xff]  ;;  %883 = vset.pattern.permute.xlu1 %v884_v3  ;;  %882 = vset.pattern.permute.xlu0 %v884_v3 }
   0x2   :  { %v841_v4 = vpack.c.bf16 %v54_v1, %v53_v0  ;;  %v56_v5 = vld [vmem:[%s1235_s0 + $0x18] sm:$0xff]  ;;  %v21_v6 = vld [vmem:[%s1236_s1] sm:$0xff]  ;;  %v22_v10 = vld [vmem:[%s1236_s1 + $0x8] sm:$0xff] }
   0x3   :  { %v845_v7 = vpack.c.bf16 %v56_v5, %v55_v2  ;;  %793 = vmatprep.mubr.msk.f32.mxu0 %vm249_vm0, %v21_v6  ;;  %v73_v8 = vld [vmem:[%s1237_s2 + $0x80] sm:$0xff]  ;;  %v74_v11 = vld [vmem:[%s1237_s2 + $0x88] sm:$0xff]  ;;  %v23_v12 = vld [vmem:[%s1236_s1 + $0x10] sm:$0xff] }
   0x4   :  { %842 = vmatprep.subr.bf16.mxu0 %v841_v4  ;;  %v57_v9 = vld [vmem:[%s1237_s2] sm:$0xff]  ;;  %171 = vperm.xlu0 %882, %v73_v8   ;;  %v58_v13 = vld [vmem:[%s1237_s2 + $0x8] sm:$0xff]  ;;  %v24_v14 = vld [vmem:[%s1236_s1 + $0x18] sm:$0xff] }
   0x5   :  { %844 = vmatpush3.bf16.msra.mxu0 %v841_v4  ;;  %91 = vperm.xlu1 %883, %v57_v9   ;;  %v75_v15 = vld [vmem:[%s1237_s2 + $0x90] sm:$0xff]  ;;  %v25_v16 = vld [vmem:[%s1236_s1 + $0x20] sm:$0xff]  ;;  %v76_v17 = vld [vmem:[%s1237_s2 + $0x98] sm:$0xff] }
   0x6   :  { %846 = vmatprep.subr.bf16.mxu0 %v845_v7  ;;  %v26_v18 = vld [vmem:[%s1236_s1 + $0x28] sm:$0xff]  ;;  %v59_v19 = vld [vmem:[%s1237_s2 + $0x10] sm:$0xff]  ;;  %v60_v21 = vld [vmem:[%s1237_s2 + $0x18] sm:$0xff] }
   0x7   :  { %v27_v20 = vld [vmem:[%s1236_s1 + $0x30] sm:$0xff]  ;;  %v28_v22 = vld [vmem:[%s1236_s1 + $0x38] sm:$0xff]  ;;  %v77_v23 = vld [vmem:[%s1237_s2 + $0xa0] sm:$0xff] }
   0x8   :  { %176 = vperm.xlu0 %882, %v74_v11   ;;  %v29_v24 = vld [vmem:[%s1236_s1 + $0x40] sm:$0xff]  ;;  %v78_v25 = vld [vmem:[%s1237_s2 + $0xa8] sm:$0xff]  ;;  %v31_v28 = vld [vmem:[%s1236_s1 + $0x50] sm:$0xff] }
   0x9   :  { %848 = vmatpush3.bf16.msra.mxu0 %v845_v7  ;;  %96 = vperm.xlu1 %883, %v58_v13   ;;  %v30_v26 = vld [vmem:[%s1236_s1 + $0x48] sm:$0xff]  ;;  %v61_v27 = vld [vmem:[%s1237_s2 + $0x20] sm:$0xff]  ;;  %v32_v30 = vld [vmem:[%s1236_s1 + $0x58] sm:$0xff] }
   0xa   :  { %v62_v29 = vld [vmem:[%s1237_s2 + $0x28] sm:$0xff]  ;;  %v79_v31 = vld [vmem:[%s1237_s2 + $0xb0] sm:$0xff]  ;;  %v33_v32 = vld [vmem:[%s1236_s1 + $0x60] sm:$0xff] }
   0xb   :  { %v80_v33 = vld [vmem:[%s1237_s2 + $0xb8] sm:$0xff]  ;;  %v34_v34 = vld [vmem:[%s1236_s1 + $0x68] sm:$0xff]  ;;  %v63_v35 = vld [vmem:[%s1237_s2 + $0x30] sm:$0xff] }
   0xc   :  { %794 = vmatmul.mubr.msk.f32.vlgmr.msra.gmra.mrb[0].mxu0 %vm249_vm0, %v22_v10  ;;  %181 = vperm.xlu0 %882, %v75_v15   ;;  %v35_v36 = vld [vmem:[%s1236_s1 + $0x70] sm:$0xff]  ;;  %v64_v37 = vld [vmem:[%s1237_s2 + $0x38] sm:$0xff]  ;;  %v81_v39 = vld [vmem:[%s1237_s2 + $0xc0] sm:$0xff] }
   0xd   :  { %796 = vmatprep.mubr.msk.f32.mxu0 %vm249_vm0, %v23_v12  ;;  %186 = vperm.xlu1 %883, %v76_v17   ;;  %v36_v38 = vld [vmem:[%s1236_s1 + $0x78] sm:$0xff]  ;;  %v37_v40 = vld [vmem:[%s1236_s1 + $0x80] sm:$0xff]  ;;  %v82_v41 = vld [vmem:[%s1237_s2 + $0xc8] sm:$0xff] }
   0xe   :  { %v38_v42 = vld [vmem:[%s1236_s1 + $0x88] sm:$0xff]  ;;  %v65_v43 = vld [vmem:[%s1237_s2 + $0x40] sm:$0xff]  ;;  %v39_v44 = vld [vmem:[%s1236_s1 + $0x90] sm:$0xff] }
   0xf   :  { %v66_v45 = vld [vmem:[%s1237_s2 + $0x48] sm:$0xff]  ;;  %v40_v46 = vld [vmem:[%s1236_s1 + $0x98] sm:$0xff]  ;;  %v83_v47 = vld [vmem:[%s1237_s2 + $0xd0] sm:$0xff] }
  0x10   :  { %797 = vmatmul.mubr.msk.f32.gmra.mrb[2].mxu0 %vm249_vm0, %v24_v14  ;;  %101 = vperm.xlu0 %882, %v59_v19   ;;  %v41_v48 = vld [vmem:[%s1236_s1 + $0xa0] sm:$0xff]  ;;  %v84_v49 = vld [vmem:[%s1237_s2 + $0xd8] sm:$0xff]  ;;  %v42_v50 = vld [vmem:[%s1236_s1 + $0xa8] sm:$0xff] }
  0x11   :  { %799 = vmatprep.mubr.msk.f32.mxu0 %vm249_vm0, %v25_v16  ;;  %106 = vperm.xlu1 %883, %v60_v21   ;;  %v67_v51 = vld [vmem:[%s1237_s2 + $0x50] sm:$0xff]  ;;  %v68_v53 = vld [vmem:[%s1237_s2 + $0x58] sm:$0xff]  ;;  %v85_v55 = vld [vmem:[%s1237_s2 + $0xe0] sm:$0xff] }
  0x12   :  { %v43_v52 = vld [vmem:[%s1236_s1 + $0xb0] sm:$0xff]  ;;  %v44_v54 = vld [vmem:[%s1236_s1 + $0xb8] sm:$0xff]  ;;  %v45_v56 = vld [vmem:[%s1236_s1 + $0xc0] sm:$0xff] }
  0x13   :  { %v86_v57 = vld [vmem:[%s1237_s2 + $0xe8] sm:$0xff]  ;;  %v69_v59 = vld [vmem:[%s1237_s2 + $0x60] sm:$0xff]  ;;  %v47_v60 = vld [vmem:[%s1236_s1 + $0xd0] sm:$0xff] }
  0x14   :  { %800 = vmatmul.mubr.msk.f32.gmra.mrb[4].mxu0 %vm249_vm0, %v26_v18  ;;  %191 = vperm.xlu0 %882, %v77_v23   ;;  %v46_v58 = vld [vmem:[%s1236_s1 + $0xc8] sm:$0xff]  ;;  %v48_v62 = vld [vmem:[%s1236_s1 + $0xd8] sm:$0xff]  ;;  %v87_v63 = vld [vmem:[%s1237_s2 + $0xf0] sm:$0xff] }
  0x15   :  { %802 = vmatprep.mubr.msk.f32.mxu0 %vm249_vm0, %v27_v20  ;;  %196 = vperm.xlu1 %883, %v78_v25   ;;  %v70_v61 = vld [vmem:[%s1237_s2 + $0x68] sm:$0xff]  ;;  %v49_v0 = vld [vmem:[%s1236_s1 + $0xe0] sm:$0xff]  ;;  %v88_v1 = vld [vmem:[%s1237_s2 + $0xf8] sm:$0xff] }
  0x16   :  { %v50_v2 = vld [vmem:[%s1236_s1 + $0xe8] sm:$0xff]  ;;  %v71_v3 = vld [vmem:[%s1237_s2 + $0x70] sm:$0xff]  ;;  %v72_v5 = vld [vmem:[%s1237_s2 + $0x78] sm:$0xff] }
  0x17   :  { %v51_v4 = vld [vmem:[%s1236_s1 + $0xf0] sm:$0xff]  ;;  %v52_v6 = vld [vmem:[%s1236_s1 + $0xf8] sm:$0xff]  ;;  %v604_v9 = vld [vmem:[%s1238_s3 + $0x8] sm:$0xff] }
  0x18   :  { %803 = vmatmul.mubr.msk.f32.gmra.mrb[6].mxu0 %vm249_vm0, %v28_v22  ;;  %111 = vperm.xlu0 %882, %v61_v27  }
  0x19   :  { %805 = vmatprep.mubr.msk.f32.mxu0 %vm249_vm0, %v29_v24  ;;  %116 = vperm.xlu1 %883, %v62_v29  }
  0x1a   :  { %671 = vmatprep.mubr.f32.mxu1 %v604_v9 }
  0x1c   :  { %806 = vmatmul.mubr.msk.f32.gmra.mrb[8].mxu0 %vm249_vm0, %v30_v26  ;;  %201 = vperm.xlu0 %882, %v79_v31  }
  0x1d   :  { %808 = vmatprep.mubr.msk.f32.mxu0 %vm249_vm0, %v31_v28  ;;  %206 = vperm.xlu1 %883, %v80_v33  }
  0x20   :  { %809 = vmatmul.mubr.msk.f32.gmra.mrb[10].mxu0 %vm249_vm0, %v32_v30  ;;  %121 = vperm.xlu0 %882, %v63_v35  }
  0x21   :  { %811 = vmatprep.mubr.msk.f32.mxu0 %vm249_vm0, %v33_v32  ;;  %126 = vperm.xlu1 %883, %v64_v37  }
  0x24   :  { %812 = vmatmul.mubr.msk.f32.gmra.mrb[12].mxu0 %vm249_vm0, %v34_v34  ;;  %211 = vperm.xlu0 %882, %v81_v39  }
  0x25   :  { %814 = vmatprep.mubr.msk.f32.mxu0 %vm249_vm0, %v35_v36  ;;  %216 = vperm.xlu1 %883, %v82_v41  }
  0x28   :  { %815 = vmatmul.mubr.msk.f32.gmra.mrb[14].mxu0 %vm249_vm0, %v36_v38  ;;  %131 = vperm.xlu0 %882, %v65_v43  }
  0x29   :  { %817 = vmatprep.mubr.msk.f32.mxu0 %vm249_vm0, %v37_v40  ;;  %136 = vperm.xlu1 %883, %v66_v45  }
  0x2c   :  { %818 = vmatmul.mubr.msk.f32.gmra.mrb[16].mxu0 %vm249_vm0, %v38_v42  ;;  %221 = vperm.xlu0 %882, %v83_v47  }
  0x2d   :  { %820 = vmatprep.mubr.msk.f32.mxu0 %vm249_vm0, %v39_v44  ;;  %226 = vperm.xlu1 %883, %v84_v49  }
  0x30   :  { %821 = vmatmul.mubr.msk.f32.gmra.mrb[18].mxu0 %vm249_vm0, %v40_v46  ;;  %141 = vperm.xlu0 %882, %v67_v51  }
  0x31   :  { %823 = vmatprep.mubr.msk.f32.mxu0 %vm249_vm0, %v41_v48  ;;  %146 = vperm.xlu1 %883, %v68_v53  }
  0x34   :  { %824 = vmatmul.mubr.msk.f32.gmra.mrb[20].mxu0 %vm249_vm0, %v42_v50  ;;  %231 = vperm.xlu0 %882, %v85_v55  }
  0x35   :  { %826 = vmatprep.mubr.msk.f32.mxu0 %vm249_vm0, %v43_v52  ;;  %236 = vperm.xlu1 %883, %v86_v57  }
  0x38   :  { %827 = vmatmul.mubr.msk.f32.gmra.mrb[22].mxu0 %vm249_vm0, %v44_v54  ;;  %151 = vperm.xlu0 %882, %v69_v59  }
  0x39   :  { %829 = vmatprep.mubr.msk.f32.mxu0 %vm249_vm0, %v45_v56  ;;  %156 = vperm.xlu1 %883, %v70_v61  }
  0x3c   :  { %830 = vmatmul.mubr.msk.f32.gmra.mrb[24].mxu0 %vm249_vm0, %v46_v58  ;;  %241 = vperm.xlu0 %882, %v87_v63  }
  0x3d   :  { %832 = vmatprep.mubr.msk.f32.mxu0 %vm249_vm0, %v47_v60  ;;  %246 = vperm.xlu1 %883, %v88_v1  }
  0x40   :  { %833 = vmatmul.mubr.msk.f32.gmra.mrb[26].mxu0 %vm249_vm0, %v48_v62  ;;  %161 = vperm.xlu0 %882, %v71_v3  }
  0x41   :  { %835 = vmatprep.mubr.msk.f32.mxu0 %vm249_vm0, %v49_v0  ;;  %166 = vperm.xlu1 %883, %v72_v5  }
  0x44   :  { %836 = vmatmul.mubr.msk.f32.gmra.mrb[28].mxu0 %vm249_vm0, %v50_v2 }
  0x45   :  { %838 = vmatprep.mubr.msk.f32.mxu0 %vm249_vm0, %v51_v4 }
  0x48   :  { %839 = vmatmul.mubr.msk.f32.gmra.mrb[30].mxu0 %vm249_vm0, %v52_v6 }
  0x83   :  { %v1151_v8 = vpop.permute.xlu0 %171 }
  0x84   :  { %v92_v7 = vpop.permute.xlu1 %91 }
  0x87   :  { %v1156_v11 = vpop.permute.xlu0 %176 }
  0x88   :  { %v97_v10 = vpop.permute.xlu1 %96 }
  0x8b   :  { %v1160_v13 = vpop.permute.xlu0 %181 }
  0x8c   :  { %v1158_v12 = vpop.permute.xlu1 %186 }
  0x8f   :  { %v102_v15 = vpop.permute.xlu0 %101 }
  0x90   :  { %v107_v14 = vpop.permute.xlu1 %106 }
  0x93   :  { %v1164_v17 = vpop.permute.xlu0 %191 }
  0x94   :  { %v1162_v16 = vpop.permute.xlu1 %196 }
  0x97   :  { %v112_v19 = vpop.permute.xlu0 %111 }
  0x98   :  { %v117_v18 = vpop.permute.xlu1 %116 }
  0x9b   :  { %v1168_v21 = vpop.permute.xlu0 %201 }
  0x9c   :  { %v1166_v20 = vpop.permute.xlu1 %206 }
  0x9f   :  { %v122_v23 = vpop.permute.xlu0 %121 }
  0xa0   :  { %v127_v22 = vpop.permute.xlu1 %126 }
  0xa3   :  { %v1172_v25 = vpop.permute.xlu0 %211 }
  0xa4   :  { %v1170_v24 = vpop.permute.xlu1 %216 }
  0xa7   :  { %v132_v27 = vpop.permute.xlu0 %131 }
  0xa8   :  { %v137_v26 = vpop.permute.xlu1 %136 }
  0xab   :  { %v1176_v29 = vpop.permute.xlu0 %221 }
  0xac   :  { %v1174_v28 = vpop.permute.xlu1 %226 }
  0xaf   :  { %v142_v38 = vpop.permute.xlu0 %141 }
  0xb0   :  { %v147_v35 = vpop.permute.xlu1 %146 }
  0xb3   :  { %v1184_v51 = vpop.permute.xlu0 %231 }
  0xb4   :  { %v1180_v48 = vpop.permute.xlu1 %236 }
  0xb7   :  { %v152_v63 = vpop.permute.xlu0 %151 }
  0xb8   :  { %v157_v60 = vpop.permute.xlu1 %156 }
  0xdf   :  { %v795_v30 = vpop.f32.mrb[0].mxu0 }
  0xe0   :  { %v418_v31 = vadd.f32 %v795_v30, %v97_v10  ;;  %v412_v32 = vpop.f32.mrb[1].mxu0  ;;  %v1190_v10 = vpop.permute.xlu1 %246 }
  0xe1   :  { %v413_v33 = vadd.f32 %v412_v32, %v92_v7 }
  0xe2   :  { %v572_v34 = vmax.f32 %v418_v31, 0.0 }
  0xe3   :  { %v571_v36 = vmax.f32 %v413_v33, 0.0  ;;  %v798_v37 = vpop.f32.mrb[2].mxu0 }
  0xe4   :  { %v428_v39 = vadd.f32 %v798_v37, %v107_v14  ;;  %v422_v40 = vpop.f32.mrb[3].mxu0  ;;  %v167_v33 = vpop.permute.xlu1 %166 }
  0xe5   :  { %v423_v41 = vadd.f32 %v422_v40, %v102_v15  ;;  %v1178_v42 = vpack.c.bf16 %v572_v34, %v571_v36 }
  0xe6   :  { %v574_v43 = vmax.f32 %v428_v39, 0.0 }
  0xe7   :  { %v573_v44 = vmax.f32 %v423_v41, 0.0  ;;  %v801_v45 = vpop.f32.mrb[4].mxu0 }
  0xe8   :  { %v438_v46 = vadd.f32 %v801_v45, %v117_v18  ;;  %v432_v47 = vpop.f32.mrb[5].mxu0  ;;  %v1194_v18 = vpop.permute.xlu0 %241 }
  0xe9   :  { %v1182_v49 = vpack.c.bf16 %v574_v43, %v573_v44  ;;  %v433_v50 = vadd.f32 %v432_v47, %v112_v19 }
  0xea   :  { %v576_v52 = vmax.f32 %v438_v46, 0.0 }
  0xeb   :  { %v575_v53 = vmax.f32 %v433_v50, 0.0  ;;  %v804_v54 = vpop.f32.mrb[6].mxu0 }
  0xec   :  { %v448_v55 = vadd.f32 %v804_v54, %v127_v22  ;;  %v442_v56 = vpop.f32.mrb[7].mxu0  ;;  %v162_v36 = vpop.permute.xlu0 %161 }
  0xed   :  { %v1186_v57 = vpack.c.bf16 %v576_v52, %v575_v53  ;;  %v443_v58 = vadd.f32 %v442_v56, %v122_v23 }
  0xee   :  { %v578_v59 = vmax.f32 %v448_v55, 0.0 }
  0xef   :  { %v577_v61 = vmax.f32 %v443_v58, 0.0  ;;  %v807_v62 = vpop.f32.mrb[8].mxu0 }
  0xf0   :  { %v458_v0 = vadd.f32 %v807_v62, %v137_v26  ;;  %v452_v1 = vpop.f32.mrb[9].mxu0 }
  0xf1   :  { %v1188_v2 = vpack.c.bf16 %v578_v59, %v577_v61  ;;  %v453_v3 = vadd.f32 %v452_v1, %v132_v27 }
  0xf2   :  { %v580_v4 = vmax.f32 %v458_v0, 0.0 }
  0xf3   :  { %v579_v5 = vmax.f32 %v453_v3, 0.0  ;;  %v810_v6 = vpop.f32.mrb[10].mxu0 }
  0xf4   :  { %v468_v7 = vadd.f32 %v810_v6, %v147_v35  ;;  %v462_v9 = vpop.f32.mrb[11].mxu0 }
  0xf5   :  { %v1192_v14 = vpack.c.bf16 %v580_v4, %v579_v5  ;;  %v463_v15 = vadd.f32 %v462_v9, %v142_v38 }
  0xf6   :  { %v582_v19 = vmax.f32 %v468_v7, 0.0 }
  0xf7   :  { %v581_v22 = vmax.f32 %v463_v15, 0.0  ;;  %v813_v23 = vpop.f32.mrb[12].mxu0 }
  0xf8   :  { %v478_v26 = vadd.f32 %v813_v23, %v157_v60  ;;  %v472_v30 = vpop.f32.mrb[13].mxu0 }
  0xf9   :  { %v1196_v31 = vpack.c.bf16 %v582_v19, %v581_v22  ;;  %v473_v27 = vadd.f32 %v472_v30, %v152_v63 }
  0xfa   :  { %v584_v32 = vmax.f32 %v478_v26, 0.0 }
  0xfb   :  { %v583_v34 = vmax.f32 %v473_v27, 0.0  ;;  %v816_v35 = vpop.f32.mrb[14].mxu0 }
  0xfc   :  { %v488_v37 = vadd.f32 %v816_v35, %v167_v33  ;;  %v482_v39 = vpop.f32.mrb[15].mxu0 }
  0xfd   :  { %v1198_v40 = vpack.c.bf16 %v584_v32, %v583_v34  ;;  %v483_v38 = vadd.f32 %v482_v39, %v162_v36 }
  0xfe   :  { %v586_v41 = vmax.f32 %v488_v37, 0.0 }
  0xff   :  { %v585_v43 = vmax.f32 %v483_v38, 0.0  ;;  %v819_v44 = vpop.f32.mrb[16].mxu0 }
 0x100   :  { %v498_v45 = vadd.f32 %v819_v44, %v1156_v11  ;;  %v492_v46 = vpop.f32.mrb[17].mxu0 }
 0x101   :  { %v1201_v47 = vpack.c.bf16 %v586_v41, %v585_v43  ;;  %v493_v50 = vadd.f32 %v492_v46, %v1151_v8 }
 0x102   :  { %v588_v52 = vmax.f32 %v498_v45, 0.0 }
 0x103   :  { %v587_v53 = vmax.f32 %v493_v50, 0.0  ;;  %v822_v54 = vpop.f32.mrb[18].mxu0 }
 0x104   :  { %v508_v55 = vadd.f32 %v822_v54, %v1158_v12  ;;  %v502_v56 = vpop.f32.mrb[19].mxu0 }
 0x105   :  { %v503_v58 = vadd.f32 %v502_v56, %v1160_v13  ;;  %v849_v59 = vpack.c.bf16 %v588_v52, %v587_v53 }
 0x106   :  { %v590_v60 = vmax.f32 %v508_v55, 0.0 }
 0x107   :  { %v589_v61 = vmax.f32 %v503_v58, 0.0  ;;  %v825_v62 = vpop.f32.mrb[20].mxu0  ;;  %850 = vmatprep.subr.bf16.mxu1 %v849_v59 }
 0x108   :  { %v518_v11 = vadd.f32 %v825_v62, %v1162_v16  ;;  %v512_v63 = vpop.f32.mrb[21].mxu0  ;;  %852 = vmatpush3.bf16.msra.mxu1 %v1178_v42 }
 0x109   :  { %v853_v0 = vpack.c.bf16 %v590_v60, %v589_v61  ;;  %v513_v8 = vadd.f32 %v512_v63, %v1164_v17 }
 0x10a   :  { %v592_v1 = vmax.f32 %v518_v11, 0.0 }
 0x10b   :  { %v591_v3 = vmax.f32 %v513_v8, 0.0  ;;  %v828_v4 = vpop.f32.mrb[22].mxu0  ;;  %854 = vmatprep.subr.bf16.mxu1 %v853_v0 }
 0x10c   :  { %v528_v12 = vadd.f32 %v828_v4, %v1166_v20  ;;  %v522_v13 = vpop.f32.mrb[23].mxu0  ;;  %856 = vmatpush3.bf16.msra.mxu1 %v1182_v49 }
 0x10d   :  { %v857_v5 = vpack.c.bf16 %v592_v1, %v591_v3  ;;  %v523_v6 = vadd.f32 %v522_v13, %v1168_v21 }
 0x10e   :  { %v594_v7 = vmax.f32 %v528_v12, 0.0 }
 0x10f   :  { %v593_v16 = vmax.f32 %v523_v6, 0.0  ;;  %v831_v9 = vpop.f32.mrb[24].mxu0  ;;  %858 = vmatprep.subr.bf16.mxu1 %v857_v5 }
 0x110   :  { %v538_v42 = vadd.f32 %v831_v9, %v1170_v24  ;;  %v532_v15 = vpop.f32.mrb[25].mxu0  ;;  %860 = vmatpush3.bf16.msra.mxu1 %v1186_v57 }
 0x111   :  { %v861_v17 = vpack.c.bf16 %v594_v7, %v593_v16  ;;  %v533_v19 = vadd.f32 %v532_v15, %v1172_v25 }
 0x112   :  { %v596_v22 = vmax.f32 %v538_v42, 0.0 }
 0x113   :  { %v595_v20 = vmax.f32 %v533_v19, 0.0  ;;  %v834_v23 = vpop.f32.mrb[26].mxu0  ;;  %862 = vmatprep.subr.bf16.mxu1 %v861_v17 }
 0x114   :  { %v548_v49 = vadd.f32 %v834_v23, %v1174_v28  ;;  %v542_v26 = vpop.f32.mrb[27].mxu0  ;;  %864 = vmatpush3.bf16.msra.mxu1 %v1188_v2 }
 0x115   :  { %v865_v21 = vpack.c.bf16 %v596_v22, %v595_v20  ;;  %v543_v30 = vadd.f32 %v542_v26, %v1176_v29 }
 0x116   :  { %v598_v27 = vmax.f32 %v548_v49, 0.0 }
 0x117   :  { %v597_v24 = vmax.f32 %v543_v30, 0.0  ;;  %v837_v32 = vpop.f32.mrb[28].mxu0  ;;  %866 = vmatprep.subr.bf16.mxu1 %v865_v21 }
 0x118   :  { %v558_v57 = vadd.f32 %v837_v32, %v1180_v48  ;;  %v552_v33 = vpop.f32.mrb[29].mxu0  ;;  %868 = vmatpush3.bf16.msra.mxu1 %v1192_v14 }
 0x119   :  { %v869_v25 = vpack.c.bf16 %v598_v27, %v597_v24  ;;  %v553_v34 = vadd.f32 %v552_v33, %v1184_v51  ;;  %v603_v51 = vld [vmem:[%s1238_s3] sm:$0xff] }
 0x11a   :  { %v600_v35 = vmax.f32 %v558_v57, 0.0 }
 0x11b   :  { %v599_v28 = vmax.f32 %v553_v34, 0.0  ;;  %v840_v36 = vpop.f32.mrb[30].mxu0  ;;  %870 = vmatprep.subr.bf16.mxu1 %v869_v25 }
 0x11c   :  { %v568_v2 = vadd.f32 %v840_v36, %v1190_v10  ;;  %v562_v37 = vpop.f32.mrb[31].mxu0  ;;  %872 = vmatpush3.bf16.msra.mxu1 %v1196_v31  ;;  %v606_v31 = vstv %s1239_s4 }
 0x11d   :  { %v873_v29 = vpack.c.bf16 %v600_v35, %v599_v28  ;;  %v563_v39 = vadd.f32 %v562_v37, %v1194_v18 }
 0x11e   :  { %v602_v38 = vmax.f32 %v568_v2, 0.0 }
 0x11f   :  { %v601_v48 = vmax.f32 %v563_v39, 0.0  ;;  %874 = vmatprep.subr.bf16.mxu1 %v873_v29 }
 0x120   :  { %876 = vmatpush3.bf16.msra.mxu1 %v1198_v40 }
 0x121   :  { %v877_v14 = vpack.c.bf16 %v602_v38, %v601_v48 }
 0x123   :  { %878 = vmatprep.subr.bf16.mxu1 %v877_v14 }
 0x124   :  { %880 = vmatpush3.bf16.msra.mxu1 %v1201_v47 }
 0x127   :  { %672 = vmatmul.mubr.f32.vlgmr.msra.gmra.mrb[0].mxu1 %v603_v51 }
 0x1fa   :  { %v782_v10 = vpop.f32.mrb[0].mxu1 }
 0x1fb   :  { %v783_v18 = vpop.f32.mrb[1].mxu1 }
 0x1fc   :  { %v784_v41 = vadd.f32 %v783_v18, %v782_v10 }
 0x1fe   :  { %v674_v43 = vadd.f32 %v784_v41, %v606_v31 }
 0x200   :  { %677 = vst [vmem:[%s1240_s5] sm:$0xff] %v674_v43 }

</bundles_post_ra>
